<compile_context>
chip_gen: v6e
topology: v6e:2x2x1
jax: 0.10.0
libtpu: 0.0.40
codegen_flags: <defaults>
</compile_context>

<pallas_src>
import functools

import jax
import jax.numpy as jnp
from jax.experimental import pallas as pl
from jax.experimental.pallas import tpu as pltpu


# ---------------------------------------------------------------------------
# Kernels
# ---------------------------------------------------------------------------

def _cls_copy_kernel(h_ref, o_ref):
    # h_ref is a (TB, H) window of the (B, S*H) view == hidden[:, 0, :]
    o_ref[...] = h_ref[...]


def _cls_slab_kernel(h_ref, o_ref):
    # h_ref is (TB, min(S, 8), H); token 0 is the CLS token.
    o_ref[...] = h_ref[:, 0, :]


def _avg_pool_kernel(mask_ref, den_ref, h_ref, o_ref, acc_ref, *, seq_len, ts):
    s = pl.program_id(1)

    @pl.when(s == 0)
    def _init():
        acc_ref[...] = jnp.zeros_like(acc_ref)

    h = h_ref[...]                               # (TB, TS, H), native dtype
    m = mask_ref[...].astype(h.dtype)            # (TB, TS, 1), S on sublanes
    masked = h * m                               # native-dtype multiply
    if seq_len % ts != 0:
        # Zero out padded tail rows of the last sequence tile so garbage in
        # the OOB-padded block region never reaches the accumulator.
        row = jax.lax.broadcasted_iota(jnp.int32, masked.shape, 1) + s * ts
        masked = jnp.where(row < seq_len, masked, jnp.zeros_like(masked))
    # Accumulate in float32 regardless of input dtype.
    acc_ref[...] += jnp.sum(masked, axis=1, dtype=jnp.float32)

    @pl.when(s == pl.num_programs(1) - 1)
    def _finalize():
        inv = pl.reciprocal(den_ref[...], approx=False)      # (TB, 1) float32
        o_ref[...] = (acc_ref[...] * inv).astype(o_ref.dtype)


# ---------------------------------------------------------------------------
# Wrapper
# ---------------------------------------------------------------------------

def recformer_pooler(attention_mask, hidden_states, pooler_type="cls"):
    """Pallas implementation of RecformerPooler.forward."""
    B, S, H = hidden_states.shape
    assert attention_mask.shape == (B, S)
    TB = min(B, 8)

    if pooler_type == "cls":
        if H % 128 == 0:
            # Lane-aligned fast path: free reshape to (B, S*H); DMA only the
            # first H lanes of each row (== hidden[:, 0, :]).
            h2 = hidden_states.reshape(B, S * H)
            return pl.pallas_call(
                _cls_copy_kernel,
                out_shape=jax.ShapeDtypeStruct((B, H), hidden_states.dtype),
                grid=(pl.cdiv(B, TB),),
                in_specs=[pl.BlockSpec((TB, H), lambda b: (b, 0))],
                out_specs=pl.BlockSpec((TB, H), lambda b: (b, 0)),
                compiler_params=pltpu.CompilerParams(
                    dimension_semantics=("parallel",)),
            )(h2)
        # Fallback (H not a multiple of 128): read a minimal sublane-aligned
        # slab of the first min(S, 8) tokens and pick token 0.
        ts_cls = S if S <= 8 else 8
        return pl.pallas_call(
            _cls_slab_kernel,
            out_shape=jax.ShapeDtypeStruct((B, H), hidden_states.dtype),
            grid=(pl.cdiv(B, TB),),
            in_specs=[pl.BlockSpec((TB, ts_cls, H), lambda b: (b, 0, 0))],
            out_specs=pl.BlockSpec((TB, H), lambda b: (b, 0)),
            compiler_params=pltpu.CompilerParams(
                dimension_semantics=("parallel",)),
        )(hidden_states)

    if pooler_type == "avg":
        mask_f = attention_mask.astype(jnp.float32)
        mask3 = mask_f[:, :, None]                      # (B, S, 1): S -> sublanes
        den = jnp.sum(mask_f, axis=-1, keepdims=True)   # (B, 1): computed once
        # Keep the hidden block around <= 4 MiB so two double-buffered copies
        # fit comfortably inside default scoped VMEM on all generations.
        bytes_per_token = max(1, TB * H * hidden_states.dtype.itemsize)
        max_rows = max(8, (4 * 1024 * 1024) // bytes_per_token)
        TS = S if S <= max_rows else (max_rows // 8) * 8
        grid = (pl.cdiv(B, TB), pl.cdiv(S, TS))
        kernel = functools.partial(_avg_pool_kernel, seq_len=S, ts=TS)
        return pl.pallas_call(
            kernel,
            out_shape=jax.ShapeDtypeStruct((B, H), hidden_states.dtype),
            grid=grid,
            in_specs=[
                pl.BlockSpec((TB, TS, 1), lambda b, s: (b, s, 0)),   # mask
                pl.BlockSpec((TB, 1), lambda b, s: (b, 0)),          # denominator
                pl.BlockSpec((TB, TS, H), lambda b, s: (b, s, 0)),   # hidden
            ],
            out_specs=pl.BlockSpec((TB, H), lambda b, s: (b, 0)),    # accumulator
            scratch_shapes=[pltpu.VMEM((TB, H), jnp.float32)],
            compiler_params=pltpu.CompilerParams(
                dimension_semantics=("parallel", "arbitrary")),
        )(mask3, den, hidden_states)

    raise NotImplementedError(pooler_type)


# ---------------------------------------------------------------------------
# Reference + test
# ---------------------------------------------------------------------------

def _reference_pooler(attention_mask, hidden_states, pooler_type):
    if pooler_type == "cls":
        return hidden_states[:, 0]
    if pooler_type == "avg":
        return (hidden_states * attention_mask[..., None]).sum(1) / \
            attention_mask.sum(-1)[..., None]
    raise NotImplementedError(pooler_type)


if __name__ == "__main__":
    key = jax.random.PRNGKey(0)
    k_h, k_m = jax.random.split(key)

    ok = True
    # (2, 8, 128) exercises the lane-aligned cls fast path; (2, 8, 32) the
    # sublane-slab fallback and the non-128 avg path.
    for (B, S, H) in [(2, 8, 128), (2, 8, 32)]:
        hidden_states = jax.random.normal(k_h, (B, S, H), dtype=jnp.float32)
        # Attention mask: first token always attended (CLS), rest random 0/1.
        rand_mask = (jax.random.uniform(k_m, (B, S)) > 0.3).astype(jnp.float32)
        attention_mask = rand_mask.at[:, 0].set(1.0)

        for pooler_type in ("cls", "avg"):
            out = recformer_pooler(attention_mask, hidden_states, pooler_type)
            out = jax.block_until_ready(out)
            ref = _reference_pooler(attention_mask, hidden_states, pooler_type)
            if out.shape != (B, H):
                ok = False
            if not jnp.allclose(out, ref, atol=1e-5, rtol=1e-5):
                ok = False

    print("KERNEL_OK" if ok else "KERNEL_MISMATCH")
</pallas_src>

<mosaic_0001>
module attributes {stable_mosaic.version = 11 : i64} {
  func.func @_cls_copy_kernel(%arg0: i32, %arg1: memref<2x128xf32, #tpu.memory_space<vmem>>, %arg2: memref<2x128xf32, #tpu.memory_space<vmem>>) attributes {dimension_semantics = [#tpu.dimension_semantics<parallel>], iteration_bounds = array<i64: 1>, scalar_prefetch = 0 : i64, scratch_operands = 0 : i64, tpu.core_type = #tpu.core_type<tc>, window_params = [{transform_indices = @transform_0, window_bounds = array<i64: 2, 128>}, {transform_indices = @transform_1, window_bounds = array<i64: 2, 128>}]} {
    %c0 = arith.constant 0 : index
    %c0_0 = arith.constant 0 : index
    %0 = vector.load %arg1[%c0, %c0_0] : memref<2x128xf32, #tpu.memory_space<vmem>>, vector<2x128xf32>
    %c0_1 = arith.constant 0 : index
    %c0_2 = arith.constant 0 : index
    %1 = vector.load %arg2[%c0_1, %c0_2] : memref<2x128xf32, #tpu.memory_space<vmem>>, vector<2x128xf32>
    tpu.vector_store %arg2[%c0_1, %c0_2], %0 {strides = array<i32>} : memref<2x128xf32, #tpu.memory_space<vmem>>, vector<2x128xf32>,
    return
  }
  func.func @transform_0(%arg0: i32) -> (i32, i32) {
    %c0_i32 = arith.constant 0 : i32
    %c0_i32_0 = arith.constant 0 : i32
    return %arg0, %c0_i32 : i32, i32
  }
  func.func @transform_1(%arg0: i32) -> (i32, i32) {
    %c0_i32 = arith.constant 0 : i32
    %c0_i32_0 = arith.constant 0 : i32
    return %arg0, %c0_i32 : i32, i32
  }
}

</mosaic_0001>

<bundles_post_ra>
// kernel: tpu_custom_call.1
= control target key start
LH: loop header
LB: loop body
LE: loop exit
PB: predicated region body
PF: predicated region fallthrough
CT: control target
= control target key end

     0   :  { %6 = vsyncpa [#allocation3], 0  ;;  %s102_s0 = inlined_call_operand.hbm [shape: f32[2,1024], index: 0, kind: input, shape index: {}]   ;;  %s103_s1 = inlined_call_operand.hbm [shape: f32[2,128], index: 1, kind: output, shape index: {}]  }
   0x1   :  { %7 = vsyncpa [#allocation4], 0  ;;  %s84_s6 = smov [#allocation2]  }
   0x2   :  { %s14_s7 = sshll.u32 %s84_s6, 4  ;;  %s15_s7 = int_to_ptr.vmem [resolvable:$true] %s14_s7 }
   0x3   :  { %s48_s8 = scalar_lea.vmem %s15_s7, 32  ;;  %p53_p1 = scmp.lt.s32.totalorder %s15_s7, %s15_s7 }
   0x4   :  { %p49_p0 = scmp.ne.s32.totalorder %s15_s7, %s48_s8  ;;  %p54_p2 = scmp.lt.s32.totalorder %s48_s8, %s48_s8 }
   0x6   :  { %p55_p3 = por %p54_p2, %p53_p1 }
   0x8   :  { %p56_p4 = pnand %p55_p3, %p49_p0 }
   0xa   :  { %59 = shalt.err (!%p56_p4)
}
   0xb   :  { %17 = dma.hbm_to_vmem [thread:$0]  %s102_s0, 32, %s15_s7, [#allocation3]  }
   0xc   :  { %80 = dma.done.wait [#allocation3], 32  }
   0xd   :  { %81 = vsyncadd [#allocation3], 4294967264  ;;  %s85_s11 = smov [#allocation5]   ;;  %v21_v0 = vld [vmem:[#allocation2] sm:$0x3] }
   0xe   :  { %s29_s12 = sshll.u32 %s85_s11, 4  ;;  %22 = vst [vmem:[#allocation5] sm:$0x3] %v21_v0  ;;  %s30_s12 = int_to_ptr.vmem [resolvable:$true] %s29_s12 }
   0xf   :  { %s60_s13 = scalar_lea.vmem %s30_s12, 32  ;;  %p65_p6 = scmp.lt.s32.totalorder %s30_s12, %s30_s12 }
  0x10   :  { %p61_p5 = scmp.ne.s32.totalorder %s30_s12, %s60_s13  ;;  %p66_p7 = scmp.lt.s32.totalorder %s60_s13, %s60_s13 }
  0x12   :  { %p67_p8 = por %p66_p7, %p65_p6 }
  0x14   :  { %p68_p9 = pnand %p67_p8, %p61_p5 }
  0x16   :  { %71 = shalt.err (!%p68_p9)
}
  0x17   :  { %32 = dma.vmem_to_hbm [thread:$0]  %s30_s12, 32, %s103_s1, [#allocation4]  }
  0x18   :  { %82 = dma.done.wait [#allocation4], 32  }
  0x19   :  { %83 = vsyncadd [#allocation4], 4294967264 }
  0x1a   :  { %36 = vsyncpa [#allocation3], 1 }
  0x1b   :  { %37 = vsyncpa [#allocation4], 1 }

</bundles_post_ra>
